<compile_context>
chip_gen: v6e
topology: v6e:2x2x1
jax: 0.10.0
libtpu: 0.0.40
codegen_flags: <defaults>
</compile_context>

<pallas_src>
from functools import partial

import jax
import jax.numpy as jnp
from jax.experimental import pallas as pl
from jax.experimental.pallas import tpu as pltpu


def _scatter_mean_kernel(wm_ref, wt_ref, seg_ref, feat_ref, out_ref, *, count_row, tm):
    """One work item: accumulate feat_tile @ onehot into the resident (CP, TM) out tile.

    wm_ref / wt_ref: scalar-prefetched (SMEM) work-item arrays (m-tile id, point-tile id).
    seg_ref: (TN, 1) int32 segment id per point (-1 = invalid/padded).
    feat_ref: (CP, TN) bf16 transposed features (row `count_row` is the ones/count row).
    out_ref: (CP, TM) f32 accumulator tile (resident across a run of equal m-tile ids).
    """
    i = pl.program_id(0)
    nwork = pl.num_programs(0)

    m_cur = wm_ref[i]
    m_prev = wm_ref[jnp.maximum(i - 1, 0)]
    m_next = wm_ref[jnp.minimum(i + 1, nwork - 1)]
    is_first = jnp.logical_or(i == 0, m_cur != m_prev)          # first work item for this m-tile
    is_last = jnp.logical_or(i == nwork - 1, m_cur != m_next)   # last work item for this m-tile

    @pl.when(is_first)
    def _():
        out_ref[...] = jnp.zeros_like(out_ref)

    tn = seg_ref.shape[0]
    seg = seg_ref[...]                                           # (TN, 1) int32
    local = seg - m_cur * tm                                     # row index within this m-tile
    cols = jax.lax.broadcasted_iota(jnp.int32, (tn, tm), 1)      # loop-invariant column iota
    onehot = (local == cols).astype(jnp.bfloat16)                # (TN, TM), exact 0/1 in bf16

    # bf16 x bf16 MXU matmul with f32 accumulation; LHS has only CP=16 rows (lane-dense out).
    out_ref[...] += jnp.dot(feat_ref[...], onehot,
                            preferred_element_type=jnp.float32)  # (CP, TM)

    @pl.when(is_last)
    def _():
        acc = out_ref[...]
        cnt = acc[count_row:count_row + 1, :]                    # (1, TM) point counts
        inv = pl.reciprocal(jnp.maximum(cnt, 1.0), approx=False) # EUP reciprocal, exact
        out_ref[...] = acc * inv


def _scatter_mean_pallas(work_m, work_t, seg_col, feat_t, *, m_out, tm, tn, cp, count_row):
    """work_m/work_t: (n_work,) int32 scalar-prefetch work list (sorted by work_m).
    seg_col: (N_pad, 1) int32; feat_t: (CP, N_pad) bf16. Returns (CP, m_out) f32."""
    n_work = work_m.shape[0]
    kernel = partial(_scatter_mean_kernel, count_row=count_row, tm=tm)
    return pl.pallas_call(
        kernel,
        out_shape=jax.ShapeDtypeStruct((cp, m_out), jnp.float32),
        grid_spec=pltpu.PrefetchScalarGridSpec(
            num_scalar_prefetch=2,
            grid=(n_work,),
            in_specs=[
                # segment ids of the current point tile (sublane-major, tiny DMA)
                pl.BlockSpec((tn, 1), lambda i, wm, wt: (wt[i], 0)),
                # transposed bf16 feature tile (channels on sublanes, points on lanes)
                pl.BlockSpec((cp, tn), lambda i, wm, wt: (0, wt[i])),
            ],
            # data-dependent output tile: lane-dense (CP, TM), revisited only in sorted runs
            out_specs=pl.BlockSpec((cp, tm), lambda i, wm, wt: (0, wm[i])),
        ),
        compiler_params=pltpu.CompilerParams(
            # single reduction-style axis: output tiles are accumulated over work-item runs
            dimension_semantics=("arbitrary",)),
    )(work_m, work_t, seg_col, feat_t)


def dynamic_simple_vfe_forward(features, coors, spatial_shape, *, TN=256, TM=256):
    """JAX/Pallas equivalent of DynamicSimpleVFE.forward.

    features: (N, C) float; coors: (N, 4) int32 as (batch, z, y, x).
    spatial_shape: (Dz, Dy, Dx) voxel grid extents (per batch).
    Returns (voxel_feats (M_pad, C) f32, voxel_coors (M_pad, 4) int32, num_voxels scalar).
    """
    # TODO(synk): PyTorch returns tensors with a data-dependent number of voxels; here the
    # outputs are padded to M_pad rows with a num_voxels scalar (unique coords sorted by key).
    assert TM >= TN and TN % 128 == 0 and TM % 128 == 0
    features = features.astype(jnp.float32)   # force_fp32 input cast
    coors = coors.astype(jnp.int32)
    N, C = features.shape
    Dz, Dy, Dx = spatial_shape
    CP = 16                                    # sublane-packed channel rows (bf16 tile height)
    assert C + 1 <= CP

    valid = jnp.all(coors >= 0, axis=1)
    key = ((coors[:, 0] * Dz + coors[:, 1]) * Dy + coors[:, 2]) * Dx + coors[:, 3]
    BIG = jnp.iinfo(jnp.int32).max
    key = jnp.where(valid, key, BIG)

    uniq_keys, inv = jnp.unique(key, return_inverse=True, size=N, fill_value=BIG)
    inv = inv.reshape(N).astype(jnp.int32)
    num_voxels = jnp.sum(uniq_keys != BIG).astype(jnp.int32)

    # Sort points by key: segment ids become non-decreasing, invalid points go to the tail.
    order = jnp.argsort(key)
    seg_sorted = jnp.where(valid, inv, -1)[order]          # -1 never matches any output row
    feat_sorted = features[order]
    valid_sorted = valid[order]

    # Pad the point dimension to a multiple of TN.
    n_pt = -(-N // TN)
    N_pad = n_pt * TN
    pad = N_pad - N
    if pad:
        seg_sorted = jnp.pad(seg_sorted, (0, pad), constant_values=-1)
        feat_sorted = jnp.pad(feat_sorted, ((0, pad), (0, 0)))
        valid_sorted = jnp.pad(valid_sorted, (0, pad))

    # Transposed lane-dense feature layout, bf16 for the MXU (accumulation stays f32).
    feat_t = jnp.zeros((CP, N_pad), jnp.float32)
    feat_t = feat_t.at[:C, :].set(feat_sorted.T)
    feat_t = feat_t.at[C, :].set(valid_sorted.astype(jnp.float32))   # count row
    feat_t = feat_t.astype(jnp.bfloat16)

    # Work-item list: each point tile touches at most 2 consecutive TM-row output tiles
    # (points are sorted, so valid seg ids per tile span <= TN consecutive values <= TM).
    n_m = -(-N // TM)                 # real output tiles
    dummy_m = n_m                     # extra discarded tile for padded/duplicate work items
    M_out = (n_m + 1) * TM
    seg2d = seg_sorted.reshape(n_pt, TN)
    v2d = valid_sorted.reshape(n_pt, TN)
    tile_min = jnp.min(jnp.where(v2d, seg2d, jnp.int32(2 ** 30)), axis=1)
    tile_max = jnp.max(jnp.where(v2d, seg2d, -1), axis=1)
    has_valid = tile_max >= 0
    m_a = jnp.where(has_valid, tile_min // TM, dummy_m).astype(jnp.int32)
    m_b_raw = tile_max // TM
    m_b = jnp.where(has_valid & (m_b_raw != m_a), m_b_raw, dummy_m).astype(jnp.int32)

    work_m = jnp.concatenate([m_a, m_b])                                  # (2*n_pt,)
    work_t = jnp.concatenate([jnp.arange(n_pt, dtype=jnp.int32)] * 2)
    ord_w = jnp.argsort(work_m)       # sort by m-tile so output blocks are visited in runs
    work_m = work_m[ord_w].astype(jnp.int32)
    work_t = work_t[ord_w].astype(jnp.int32)

    out_t = _scatter_mean_pallas(work_m, work_t, seg_sorted.reshape(N_pad, 1), feat_t,
                                 m_out=M_out, tm=TM, tn=TN, cp=CP, count_row=C)

    M_pad = ((N + 7) // 8) * 8
    voxel_feats = out_t[:C, :M_pad].T                                     # (M_pad, C) f32

    # Decode unique keys back to (batch, z, y, x); fill/invalid rows -> -1 / zeros.
    k = uniq_keys
    cx = k % Dx
    k2 = k // Dx
    cy = k2 % Dy
    k3 = k2 // Dy
    cz = k3 % Dz
    cb = k3 // Dz
    voxel_coors = jnp.stack([cb, cz, cy, cx], axis=1).astype(jnp.int32)
    is_real = (uniq_keys != BIG)
    voxel_coors = jnp.where(is_real[:, None], voxel_coors, -1)
    voxel_coors = jnp.pad(voxel_coors, ((0, M_pad - N), (0, 0)), constant_values=-1)
    is_real_pad = jnp.pad(is_real, (0, M_pad - N))
    # `where` (not multiply) so never-visited output tiles (uninitialized HBM) are zeroed.
    voxel_feats = jnp.where(is_real_pad[:, None], voxel_feats, 0.0)

    return voxel_feats, voxel_coors, num_voxels


if __name__ == "__main__":
    key0 = jax.random.PRNGKey(0)
    k1, k2, k3, k4, k5 = jax.random.split(key0, 5)

    N, C = 256, 4
    Dz, Dy, Dx = 2, 8, 8          # small voxel grid
    num_batch = 2

    features = jax.random.normal(k1, (N, C), dtype=jnp.float32)
    coors = jnp.stack([
        jax.random.randint(k2, (N,), 0, num_batch),
        jax.random.randint(k3, (N,), 0, Dz),
        jax.random.randint(k4, (N,), 0, Dy),
        jax.random.randint(k5, (N,), 0, Dx),
    ], axis=1).astype(jnp.int32)
    # make a few points invalid to exercise the drop path
    coors = coors.at[:10, :].set(-1)

    voxel_feats, voxel_coors, num_voxels = dynamic_simple_vfe_forward(
        features, coors, (Dz, Dy, Dx))
    jax.block_until_ready((voxel_feats, voxel_coors, num_voxels))

    # Reference check with plain-JAX segment ops (features rounded to bf16 to match the
    # kernel's bf16 MXU inputs; accumulation and division are f32 in both).
    feat_bf = features.astype(jnp.bfloat16).astype(jnp.float32)
    valid = jnp.all(coors >= 0, axis=1)
    key = ((coors[:, 0] * Dz + coors[:, 1]) * Dy + coors[:, 2]) * Dx + coors[:, 3]
    BIG = jnp.iinfo(jnp.int32).max
    key = jnp.where(valid, key, BIG)
    uniq_keys, inv = jnp.unique(key, return_inverse=True, size=N, fill_value=BIG)
    seg_ids = jnp.where(valid, inv.reshape(N), N)
    sums = jax.ops.segment_sum(feat_bf, seg_ids, num_segments=N + 1)[:N]
    cnts = jax.ops.segment_sum(valid.astype(jnp.float32), seg_ids, num_segments=N + 1)[:N]
    ref = sums / jnp.maximum(cnts, 1.0)[:, None]
    M_pad = ((N + 7) // 8) * 8
    ref = jnp.pad(ref, ((0, M_pad - N), (0, 0)))
    is_real_pad = jnp.pad(uniq_keys != BIG, (0, M_pad - N))
    ref = jnp.where(is_real_pad[:, None], ref, 0.0)

    assert jnp.allclose(voxel_feats, ref, atol=1e-4, rtol=1e-4), "feature mismatch vs reference"

    # Coordinate decode check: re-encoding real rows must reproduce the unique keys.
    enc = ((voxel_coors[:, 0] * Dz + voxel_coors[:, 1]) * Dy
           + voxel_coors[:, 2]) * Dx + voxel_coors[:, 3]
    ref_keys = jnp.pad(uniq_keys, (0, M_pad - N), constant_values=BIG)
    coor_ok = jnp.where(is_real_pad, enc == ref_keys, voxel_coors[:, 0] == -1)
    assert bool(jnp.all(coor_ok)), "coordinate mismatch vs reference"

    print("KERNEL_OK")
</pallas_src>

<mosaic_0001>
module attributes {stable_mosaic.version = 11 : i64} {
  func.func @_scatter_mean_kernel(%arg0: i32, %arg1: memref<2xi32, #tpu.memory_space<smem>>, %arg2: memref<2xi32, #tpu.memory_space<smem>>, %arg3: memref<256x1xi32, #tpu.memory_space<vmem>>, %arg4: memref<16x256xbf16, #tpu.memory_space<vmem>>, %arg5: memref<16x256xf32, #tpu.memory_space<vmem>>) attributes {dimension_semantics = [#tpu.dimension_semantics<arbitrary>], iteration_bounds = array<i64: 2>, scalar_prefetch = 2 : i64, scratch_operands = 0 : i64, tpu.core_type = #tpu.core_type<tc>, window_params = [{transform_indices = @transform_0, window_bounds = array<i64: 256, 1>}, {transform_indices = @transform_1, window_bounds = array<i64: 16, 256>}, {transform_indices = @transform_2, window_bounds = array<i64: 16, 256>}]} {
    %0 = arith.index_cast %arg0 : i32 to index
    %1 = memref.load %arg1[%0] : memref<2xi32, #tpu.memory_space<smem>>
    %c1_i32 = arith.constant 1 : i32
    %2 = arith.subi %arg0, %c1_i32 : i32
    %c0_i32 = arith.constant 0 : i32
    %3 = arith.maxsi %2, %c0_i32 : i32
    %4 = arith.index_cast %3 : i32 to index
    %5 = memref.load %arg1[%4] : memref<2xi32, #tpu.memory_space<smem>>
    %c1_i32_0 = arith.constant 1 : i32
    %6 = arith.addi %arg0, %c1_i32_0 : i32
    %c1_i32_1 = arith.constant 1 : i32
    %7 = arith.minsi %6, %c1_i32_1 : i32
    %8 = arith.index_cast %7 : i32 to index
    %9 = memref.load %arg1[%8] : memref<2xi32, #tpu.memory_space<smem>>
    %c0_i32_2 = arith.constant 0 : i32
    %10 = arith.cmpi eq, %arg0, %c0_i32_2 : i32
    %11 = arith.cmpi ne, %1, %5 : i32
    %12 = arith.ori %10, %11 : i1
    %c1_i32_3 = arith.constant 1 : i32
    %13 = arith.cmpi eq, %arg0, %c1_i32_3 : i32
    %14 = arith.cmpi ne, %1, %9 : i32
    %15 = arith.ori %13, %14 : i1
    %16 = arith.extui %12 : i1 to i32
    %c0_i32_4 = arith.constant 0 : i32
    %17 = arith.cmpi ne, %16, %c0_i32_4 : i32
    scf.if %17 {
      %cst_13 = arith.constant 0.000000e+00 : f32
      %35 = vector.broadcast %cst_13 : f32 to vector<16x256xf32>
      %c0_14 = arith.constant 0 : index
      %c0_15 = arith.constant 0 : index
      %36 = vector.load %arg5[%c0_14, %c0_15] : memref<16x256xf32, #tpu.memory_space<vmem>>, vector<16x256xf32>
      tpu.vector_store %arg5[%c0_14, %c0_15], %35 {strides = array<i32>} : memref<16x256xf32, #tpu.memory_space<vmem>>, vector<16x256xf32>,
    } else {
    }
    %c0 = arith.constant 0 : index
    %c0_5 = arith.constant 0 : index
    %18 = vector.load %arg3[%c0, %c0_5] : memref<256x1xi32, #tpu.memory_space<vmem>>, vector<256x1xi32>
    %c256_i32 = arith.constant 256 : i32
    %19 = arith.muli %1, %c256_i32 : i32
    %20 = vector.broadcast %19 : i32 to vector<256x1xi32>
    %21 = arith.subi %18, %20 : vector<256x1xi32>
    %22 = tpu.iota {dimensions = array<i32: 1>} : vector<256x256xi32>
    %23 = vector.broadcast %21 : vector<256x1xi32> to vector<256x256xi32>
    %24 = arith.cmpi eq, %23, %22 : vector<256x256xi32>
    %25 = arith.extui %24 : vector<256x256xi1> to vector<256x256xi32>
    %26 = arith.sitofp %25 : vector<256x256xi32> to vector<256x256xf32>
    %27 = arith.truncf %26 : vector<256x256xf32> to vector<256x256xbf16>
    %c0_6 = arith.constant 0 : index
    %c0_7 = arith.constant 0 : index
    %28 = vector.load %arg5[%c0_6, %c0_7] : memref<16x256xf32, #tpu.memory_space<vmem>>, vector<16x256xf32>
    %c0_8 = arith.constant 0 : index
    %c0_9 = arith.constant 0 : index
    %29 = vector.load %arg4[%c0_8, %c0_9] : memref<16x256xbf16, #tpu.memory_space<vmem>>, vector<16x256xbf16>
    %cst = arith.constant dense<0.000000e+00> : vector<16x256xf32>
    %30 = tpu.matmul %29, %27, %cst {dimension_numbers = #tpu.dot_dimension_numbers<[1], [0], [0], [1], [0, 0, 1, 1], [], []>} : vector<16x256xbf16>, vector<256x256xbf16>, vector<16x256xf32> -> vector<16x256xf32>
    %31 = arith.addf %28, %30 : vector<16x256xf32>
    %c0_10 = arith.constant 0 : index
    %c0_11 = arith.constant 0 : index
    %32 = vector.load %arg5[%c0_10, %c0_11] : memref<16x256xf32, #tpu.memory_space<vmem>>, vector<16x256xf32>
    tpu.vector_store %arg5[%c0_10, %c0_11], %31 {strides = array<i32>} : memref<16x256xf32, #tpu.memory_space<vmem>>, vector<16x256xf32>,
    %33 = arith.extui %15 : i1 to i32
    %c0_i32_12 = arith.constant 0 : i32
    %34 = arith.cmpi ne, %33, %c0_i32_12 : i32
    scf.if %34 {
      %c0_13 = arith.constant 0 : index
      %c0_14 = arith.constant 0 : index
      %35 = vector.load %arg5[%c0_13, %c0_14] : memref<16x256xf32, #tpu.memory_space<vmem>>, vector<16x256xf32>
      %36 = vector.extract_strided_slice %35 {offsets = [4, 0], sizes = [1, 256], strides = [1, 1]} : vector<16x256xf32> to vector<1x256xf32>
      %cst_15 = arith.constant 1.000000e+00 : f32
      %37 = vector.broadcast %cst_15 : f32 to vector<1x256xf32>
      %38 = arith.maximumf %36, %37 : vector<1x256xf32>
      %39 = tpu.reciprocal %38 : vector<1x256xf32> -> vector<1x256xf32>
      %40 = vector.broadcast %39 : vector<1x256xf32> to vector<16x256xf32>
      %41 = arith.mulf %35, %40 : vector<16x256xf32>
      %c0_16 = arith.constant 0 : index
      %c0_17 = arith.constant 0 : index
      %42 = vector.load %arg5[%c0_16, %c0_17] : memref<16x256xf32, #tpu.memory_space<vmem>>, vector<16x256xf32>
      tpu.vector_store %arg5[%c0_16, %c0_17], %41 {strides = array<i32>} : memref<16x256xf32, #tpu.memory_space<vmem>>, vector<16x256xf32>,
    } else {
    }
    return
  }
  func.func @transform_0(%arg0: i32, %arg1: memref<2xi32, #tpu.memory_space<smem>>, %arg2: memref<2xi32, #tpu.memory_space<smem>>) -> (i32, i32) {
    %0 = arith.index_cast %arg0 : i32 to index
    %1 = memref.load %arg2[%0] : memref<2xi32, #tpu.memory_space<smem>>
    %c0_i32 = arith.constant 0 : i32
    %c0_i32_0 = arith.constant 0 : i32
    return %1, %c0_i32 : i32, i32
  }
  func.func @transform_1(%arg0: i32, %arg1: memref<2xi32, #tpu.memory_space<smem>>, %arg2: memref<2xi32, #tpu.memory_space<smem>>) -> (i32, i32) {
    %0 = arith.index_cast %arg0 : i32 to index
    %1 = memref.load %arg2[%0] : memref<2xi32, #tpu.memory_space<smem>>
    %c0_i32 = arith.constant 0 : i32
    %c0_i32_0 = arith.constant 0 : i32
    return %c0_i32, %1 : i32, i32
  }
  func.func @transform_2(%arg0: i32, %arg1: memref<2xi32, #tpu.memory_space<smem>>, %arg2: memref<2xi32, #tpu.memory_space<smem>>) -> (i32, i32) {
    %0 = arith.index_cast %arg0 : i32 to index
    %1 = memref.load %arg1[%0] : memref<2xi32, #tpu.memory_space<smem>>
    %c0_i32 = arith.constant 0 : i32
    %c0_i32_0 = arith.constant 0 : i32
    return %c0_i32, %1 : i32, i32
  }
}

</mosaic_0001>

<bundles_post_ra>
// kernel: tpu_custom_call.1
= control target key start
LH: loop header
LB: loop body
LE: loop exit
PB: predicated region body
PF: predicated region fallthrough
CT: control target
= control target key end

     0   :  { %s1448_s0 = inlined_call_operand.vmem [shape: s32[2], index: 0, kind: input, shape index: {}]   ;;  %s1449_s2 = inlined_call_operand.vmem [shape: s32[256,1], index: 2, kind: input, shape index: {}]   ;;  %s1450_s3 = inlined_call_operand.vmem [shape: bf16[16,256], index: 3, kind: input, shape index: {}]   ;;  %s1451_s4 = inlined_call_operand.hbm [shape: f32[16,512], index: 4, kind: output, shape index: {}]   ;;  %s1452_s1 = inlined_call_operand.vmem [shape: s32[2], index: 1, kind: input, shape index: {}]  }
   0x1   :  { %s9_s17 = sshll.u32 %s1448_s0, 4  ;;  %s13_s20 = sshll.u32 %s1452_s1, 4  ;;  %s10_s17 = int_to_ptr.vmem [resolvable:$true] %s9_s17  ;;  %s14_s20 = int_to_ptr.vmem [resolvable:$true] %s13_s20 }
   0x2   :  { %s995_s21 = scalar_lea.vmem %s10_s17, 16  ;;  %p1000_p1 = scmp.lt.s32.totalorder %s10_s17, %s10_s17 }
   0x3   :  { %p996_p0 = scmp.ne.s32.totalorder %s10_s17, %s995_s21  ;;  %p1001_p2 = scmp.lt.s32.totalorder %s995_s21, %s995_s21 }
   0x5   :  { %p1002_p3 = por %p1001_p2, %p1000_p1 }
   0x7   :  { %p1003_p4 = pnand %p1002_p3, %p996_p0 }
   0x9   :  { %1006 = shalt.err (!%p1003_p4)  }
   0xa   :  { %s1083_s22 = smov [#allocation3]   ;;  %s1007_s23 = scalar_lea.vmem %s14_s20, 16 }
   0xb   :  { %12 = dma.vmem_to_smem %s10_s17, 16, %s1083_s22, [#allocation2] }
   0xc   :  { %p1008_p5 = scmp.ne.s32.totalorder %s14_s20, %s1007_s23  ;;  %p1012_p6 = scmp.lt.s32.totalorder %s14_s20, %s14_s20 }
   0xd   :  { %p1013_p7 = scmp.lt.s32.totalorder %s1007_s23, %s1007_s23 }
   0xf   :  { %p1014_p8 = por %p1013_p7, %p1012_p6 }
  0x11   :  { %p1015_p9 = pnand %p1014_p8, %p1008_p5 }
  0x13   :  { %1018 = shalt.err (!%p1015_p9)  }
  0x14   :  { %s1084_s0 = smov [#allocation4]  }
  0x15   :  { %16 = dma.vmem_to_smem %s14_s20, 16, %s1084_s0, [#allocation2] }
  0x16   :  { %1061 = dma.done.wait [#allocation2], 32 }
  0x17   :  { %1062 = vsyncadd [#allocation2], 4294967264 }
  0x18   :  { %18 = sfence }
  0x19   :  { %19 = vsyncpa [#allocation6], 0 }
  0x1a   :  { %21 = vsyncpa [#allocation6 + $0x1], 0  ;;  %s1123_s1 = smov 0   ;;  %s1125_s24 = smov 0  }
  0x1b   :  { %s1127_s25 = smov 0   ;;  %s1129_s26 = smov 0  }
  0x1c LB: > { %s1144_s27 = sadd.s32 4294967295, %s1081_s26   ;;  %s790_s28 = sadd.s32 4294967294, %s1081_s26   ;;  %s1081_s26 = sphi %s1129_s26, %s1459_s26   ;;  %s1077_s25 = sphi %s1127_s25, %s1458_s25   ;;  %s1073_s24 = sphi %s1125_s24, %s1457_s24   ;;  %s1069_s1 = sphi %s1123_s1, %s1456_s1  }
  0x1d   : > { %s1148_s29 = sadd.s32 1, %s1081_s26   ;;  %s87_s30 = sld [smem:[#allocation3 + %s1081_s26]] }
  0x1e   : > { %s88_s5 = sld [smem:[#allocation3 + %s1148_s29]]  ;;  %p102_p10 = scmp.ne.s32.totalorder %s1077_s25, %s1073_s24 }
  0x1f   : > { %p103_p11 = scmp.eq.s32.totalorder %s1144_s27, 1  ;;  %p108_p12 = scmp.ne.s32.totalorder %s1073_s24, %s1069_s1 }
  0x20   : > { %p109_p13 = scmp.eq.s32.totalorder %s790_s28, 1  ;;  %p793_p1 = scmp.ge.s32.totalorder %s1081_s26, 1 }
  0x21   : > { %p1159_p0 = por %p103_p11, %p102_p10  ;;  %p149_p3 = scmp.lt.s32.totalorder %s1081_s26, 3 }
  0x22   : > { %p1164_p2 = por %p109_p13, %p108_p12  ;;  %s92_s8 = sadd.s32 1, %s1077_s25 }
  0x23   : > { %p150_p4 = pnand %p793_p1, %p149_p3 }
  0x24   : > { %s89_s9 = ssub.s32 %s87_s30, %s88_s5  ;;  %s175_s11 = sand.u32 (!%p150_p4), 1, %s1073_s24  }
  0x25   : > { %p90_p5 = scmp.eq.s32.totalorder %s89_s9, 0  ;;  %153 = sbr.rel (%p150_p4) target bundleno = 511 (0x1ff), region = 28 }
  0x26   : > { %s178_s12 = sld [smem:[#allocation4 + %s1144_s27]] (!%p150_p4)  ;;  %s794_s13 = sshll.u32 (!%p150_p4), %s175_s11, 5 }
  0x27   : > { %s1171_s10 = scalar_select %p90_p5, %s1077_s25, %s92_s8  }
  0x28   : > { %s186_s14 = sld [smem:[#allocation4 + %s1144_s27]] (!%p150_p4)  ;;  %s799_s15 = sadd.s32 (!%p150_p4), 4294967295, %s1144_s27 }
  0x29   : > { %s201_s17 = sadd.s32 (!%p150_p4), 1, %s1144_s27  ;;  %p198_p8 = scmp.gt.s32.totalorder (!%p150_p4), %s799_s15, 0 }
  0x2a   : > { %p202_p9 = scmp.lt.s32.totalorder %s201_s17, 1  ;;  %s196_s5 = sld [smem:[#allocation3 + %s1144_s27]] }
  0x2b   : > { %s1465_s15 = smov (!%p198_p8, %s799_s15), 0  ;;  %p205_p10 = scmp.eq.s32.totalorder %s1144_s27, 0 }
  0x2c   : > { %s795_s16 = sshll.u32 %s178_s12, 5  ;;  %s1467_s17 = smov (!%p202_p9, %s201_s17), 1 }
  0x2d   : > { %p180_p6 = scmp.lt.s32.totalorder %s795_s16, 31  ;;  %s200_s8 = sld [smem:[#allocation3 + %s1465_s15]] }
  0x2e   : > { %s797_s18 = sshll.u32 %s186_s14, 1  ;;  %s204_s9 = sld [smem:[#allocation3 + %s1467_s17]] }
  0x2f   : > { %p188_p7 = scmp.lt.s32.totalorder %s797_s18, 1  ;;  %s1461_s16 = smov (!%p180_p6, %s795_s16), 31 }
  0x30   : > { %s796_s19 = sshll.u32 %s1461_s16, 3  ;;  %s1198_s14 = scalar_lea.vmem [#allocation5], %s794_s13 }
  0x31   : > { %s1463_s18 = smov (!%p188_p7, %s797_s18), 1  ;;  %s1183_s22 = scalar_lea.vmem %s1449_s2, %s796_s19 }
  0x32   : > { %s798_s23 = sshll.u32 %s1463_s18, 2 }
  0x33   : > { %s1188_s30 = scalar_lea.vmem %s1450_s3, %s798_s23  ;;  %p206_p12 = scmp.ne.s32.totalorder %s196_s5, %s200_s8 }
  0x34   : > { %p209_p13 = scmp.ne.s32.totalorder %s196_s5, %s204_s9 }
  0x35   : > { %p207_p1 = por %p206_p12, %p205_p10 }
  0x36   : > { %p1194_p3 = por %p209_p13, %p103_p11  ;;  %v1085_v0 = vmov (%p207_p1), 0.0  }
  0x37   : > { %213 = sbr.rel (!%p207_p1) target bundleno = 60 (0x3c), region = 32  ;;  %214 = vst [vmem:[%s1198_s14] sm:$0xff] (%p207_p1), %v1085_v0  ;;  %215 = vst [vmem:[%s1198_s14 + $0x8] sm:$0xff] (%p207_p1), %v1085_v0 }
  0x38   : > { %216 = vst [vmem:[%s1198_s14 + $0x10] sm:$0xff] (%p207_p1), %v1085_v0  ;;  %217 = vst [vmem:[%s1198_s14 + $0x18] sm:$0xff] (%p207_p1), %v1085_v0 }
  0x3c PF: > { %v232_v1 = vld [vmem:[%s1183_s22 + $0x70] sm:$0xff]  ;;  %s800_s13 = sshll.u32 %s196_s5, 8  ;;  %v230_v2 = vld [vmem:[%s1183_s22 + $0x60] sm:$0xff]  ;;  %v1086_v3 = vmov 0   ;;  %v233_v5 = vld [vmem:[%s1183_s22 + $0x78] sm:$0xff] }
  0x3d   : > { %987 = vset.pattern.permute.xlu1 %v1086_v3  ;;  %986 = vset.pattern.permute.xlu0 %v1086_v3  ;;  %v1206_v4 = vstv %s800_s13  ;;  %v231_v6 = vld [vmem:[%s1183_s22 + $0x68] sm:$0xff]  ;;  %v229_v11 = vld [vmem:[%s1183_s22 + $0x58] sm:$0xff]  ;;  %v228_v12 = vld [vmem:[%s1183_s22 + $0x50] sm:$0xff] }
  0x3e   : > { %v266_v7 = vsub.s32 %v232_v1, %v1206_v4  ;;  %v264_v8 = vsub.s32 %v230_v2, %v1206_v4  ;;  %v267_v9 = vsub.s32 %v233_v5, %v1206_v4  ;;  %v265_v10 = vsub.s32 %v231_v6, %v1206_v4  ;;  %v227_v15 = vld [vmem:[%s1183_s22 + $0x48] sm:$0xff]  ;;  %v226_v16 = vld [vmem:[%s1183_s22 + $0x40] sm:$0xff]  ;;  %v225_v19 = vld [vmem:[%s1183_s22 + $0x38] sm:$0xff] }
  0x3f   : > { %v263_v13 = vsub.s32 %v229_v11, %v1206_v4  ;;  %v262_v14 = vsub.s32 %v228_v12, %v1206_v4  ;;  %v261_v17 = vsub.s32 %v227_v15, %v1206_v4  ;;  %v260_v18 = vsub.s32 %v226_v16, %v1206_v4  ;;  %v224_v20 = vld [vmem:[%s1183_s22 + $0x30] sm:$0xff]  ;;  %v223_v23 = vld [vmem:[%s1183_s22 + $0x28] sm:$0xff]  ;;  %v222_v24 = vld [vmem:[%s1183_s22 + $0x20] sm:$0xff] }
  0x40   : > { %330 = vperm.xlu0 %986, %v266_v7   ;;  %324 = vperm.xlu1 %987, %v264_v8   ;;  %v259_v21 = vsub.s32 %v225_v19, %v1206_v4  ;;  %v258_v22 = vsub.s32 %v224_v20, %v1206_v4  ;;  %v257_v25 = vsub.s32 %v223_v23, %v1206_v4  ;;  %v221_v27 = vld [vmem:[%s1183_s22 + $0x18] sm:$0xff]  ;;  %v220_v28 = vld [vmem:[%s1183_s22 + $0x10] sm:$0xff]  ;;  %v219_v31 = vld [vmem:[%s1183_s22 + $0x8] sm:$0xff]  ;;  %v284_v5 = vlaneseq }
  0x41   : > { %v256_v26 = vsub.s32 %v222_v24, %v1206_v4  ;;  %v255_v29 = vsub.s32 %v221_v27, %v1206_v4  ;;  %v254_v30 = vsub.s32 %v220_v28, %v1206_v4  ;;  %v218_v32 = vld [vmem:[%s1183_s22] sm:$0xff]  ;;  %v253_v33 = vsub.s32 %v219_v31, %v1206_v4  ;;  %v249_v35 = vld [vmem:[%s1183_s22 + $0xf8] sm:$0xff]  ;;  %v248_v36 = vld [vmem:[%s1183_s22 + $0xf0] sm:$0xff] }
  0x42   : > { %v252_v34 = vsub.s32 %v218_v32, %v1206_v4  ;;  %v283_v37 = vsub.s32 %v249_v35, %v1206_v4  ;;  %v282_v38 = vsub.s32 %v248_v36, %v1206_v4  ;;  %v247_v39 = vld [vmem:[%s1183_s22 + $0xe8] sm:$0xff]  ;;  %v246_v40 = vld [vmem:[%s1183_s22 + $0xe0] sm:$0xff]  ;;  %v245_v43 = vld [vmem:[%s1183_s22 + $0xd8] sm:$0xff]  ;;  %v1272_v6 = vand.u32 127, %v284_v5 }
  0x43   : > { %v281_v41 = vsub.s32 %v247_v39, %v1206_v4  ;;  %v280_v42 = vsub.s32 %v246_v40, %v1206_v4  ;;  %v244_v44 = vld [vmem:[%s1183_s22 + $0xd0] sm:$0xff]  ;;  %v279_v45 = vsub.s32 %v245_v43, %v1206_v4  ;;  %v243_v47 = vld [vmem:[%s1183_s22 + $0xc8] sm:$0xff]  ;;  %v242_v48 = vld [vmem:[%s1183_s22 + $0xc0] sm:$0xff] }
  0x44   : > { %333 = vperm.xlu0 %986, %v267_v9   ;;  %327 = vperm.xlu1 %987, %v265_v10   ;;  %v278_v46 = vsub.s32 %v244_v44, %v1206_v4  ;;  %v277_v49 = vsub.s32 %v243_v47, %v1206_v4  ;;  %v276_v50 = vsub.s32 %v242_v48, %v1206_v4  ;;  %v241_v51 = vld [vmem:[%s1183_s22 + $0xb8] sm:$0xff]  ;;  %v240_v52 = vld [vmem:[%s1183_s22 + $0xb0] sm:$0xff]  ;;  %v239_v55 = vld [vmem:[%s1183_s22 + $0xa8] sm:$0xff]  ;;  %v1275_v9 = vadd.s32 128, %v1272_v6 }
  0x45   : > { %v275_v53 = vsub.s32 %v241_v51, %v1206_v4  ;;  %v274_v54 = vsub.s32 %v240_v52, %v1206_v4  ;;  %v238_v56 = vld [vmem:[%s1183_s22 + $0xa0] sm:$0xff]  ;;  %v273_v57 = vsub.s32 %v239_v55, %v1206_v4  ;;  %v237_v59 = vld [vmem:[%s1183_s22 + $0x98] sm:$0xff]  ;;  %v236_v60 = vld [vmem:[%s1183_s22 + $0x90] sm:$0xff] }
  0x46   : > { %v272_v58 = vsub.s32 %v238_v56, %v1206_v4  ;;  %v271_v61 = vsub.s32 %v237_v59, %v1206_v4  ;;  %v270_v62 = vsub.s32 %v236_v60, %v1206_v4  ;;  %v235_v63 = vld [vmem:[%s1183_s22 + $0x88] sm:$0xff]  ;;  %v234_v0 = vld [vmem:[%s1183_s22 + $0x80] sm:$0xff] }
  0x47   : > { %v269_v1 = vsub.s32 %v235_v63, %v1206_v4  ;;  %v268_v2 = vsub.s32 %v234_v0, %v1206_v4  ;;  %v990_v3 = vld [vmem:[%s1188_s30 + $0x4] ss:$8 sps:$4 sm:$0xff]   ;;  %v988_v40 = vld [vmem:[%s1188_s30] ss:$8 sps:$4 sm:$0xff]  }
  0x48   : > { %321 = vperm.xlu1 %987, %v263_v13   ;;  %318 = vperm.xlu0 %986, %v262_v14   ;;  %v1087_v13 = vmov 1.0|1.0   ;;  %v608_v43 = vld [vmem:[%s1198_s14 + $0x8] sm:$0xff] }
  0x49   : > { %655 = vmatprep.mubr.bf16.mxu0 %v990_v3 }
  0x4c   : > { %315 = vperm.xlu1 %987, %v261_v17   ;;  %312 = vperm.xlu0 %986, %v260_v18  }
  0x50   : > { %309 = vperm.xlu1 %987, %v259_v21   ;;  %306 = vperm.xlu0 %986, %v258_v22  }
  0x54   : > { %303 = vperm.xlu1 %987, %v257_v25   ;;  %300 = vperm.xlu0 %986, %v256_v26  }
  0x58   : > { %297 = vperm.xlu1 %987, %v255_v29   ;;  %294 = vperm.xlu0 %986, %v254_v30  }
  0x5c   : > { %291 = vperm.xlu1 %987, %v253_v33   ;;  %288 = vperm.xlu0 %986, %v252_v34  }
  0x60   : > { %381 = vperm.xlu1 %987, %v283_v37   ;;  %378 = vperm.xlu0 %986, %v282_v38  }
  0x64   : > { %375 = vperm.xlu1 %987, %v281_v41   ;;  %372 = vperm.xlu0 %986, %v280_v42   ;;  %v607_v41 = vld [vmem:[%s1198_s14] sm:$0xff] }
  0x68   : > { %369 = vperm.xlu1 %987, %v279_v45   ;;  %366 = vperm.xlu0 %986, %v278_v46   ;;  %v609_v46 = vld [vmem:[%s1198_s14 + $0x10] sm:$0xff] }
  0x6c   : > { %363 = vperm.xlu1 %987, %v277_v49   ;;  %360 = vperm.xlu0 %986, %v276_v50   ;;  %v610_v49 = vld [vmem:[%s1198_s14 + $0x18] sm:$0xff] }
  0x70   : > { %357 = vperm.xlu1 %987, %v275_v53   ;;  %354 = vperm.xlu0 %986, %v274_v54  }
  0x74   : > { %351 = vperm.xlu1 %987, %v273_v57   ;;  %348 = vperm.xlu0 %986, %v272_v58   ;;  %v686_v57 = vshrl.u32 (%p1194_p3), %v284_v5, 7 }
  0x76   : > { %v687_v58 = vsub.s32 (%p1194_p3), 4, %v686_v57 }
  0x78   : > { %345 = vperm.xlu1 %987, %v271_v61   ;;  %342 = vperm.xlu0 %986, %v270_v62  }
  0x7c   : > { %339 = vperm.xlu1 %987, %v269_v1   ;;  %336 = vperm.xlu0 %986, %v268_v2  }
  0xbb   : > { %v331_v7 = vpop.permute.xlu0 %330  ;;  %v325_v8 = vpop.permute.xlu1 %324 }
  0xbc   : > { %vm408_vm2 = vcmp.eq.s32.totalorder %v325_v8, %v1275_v9  ;;  %vm412_vm4 = vcmp.eq.s32.totalorder %v331_v7, %v1275_v9  ;;  %vm411_vm5 = vcmp.eq.s32.totalorder %v331_v7, %v1272_v6  ;;  %vm407_vm8 = vcmp.eq.s32.totalorder %v325_v8, %v1272_v6 }
  0xbf   : > { %v334_v10 = vpop.permute.xlu0 %333  ;;  %v328_v11 = vpop.permute.xlu1 %327 }
  0xc0   : > { %vm414_vm0 = vcmp.eq.s32.totalorder %v334_v10, %v1275_v9  ;;  %vm413_vm1 = vcmp.eq.s32.totalorder %v334_v10, %v1272_v6  ;;  %vm410_vm3 = vcmp.eq.s32.totalorder %v328_v11, %v1275_v9  ;;  %vm409_vm9 = vcmp.eq.s32.totalorder %v328_v11, %v1272_v6 }
  0xc1   : > { %vm867_vm6 = vmpackc.low %vm414_vm0, %vm412_vm4 }
  0xc2   : > { %868 = vmatprep.subr.msk.bf16.mxu0 %vm867_vm6, %v1087_v13  ;;  %vm869_vm7 = vmpackc.low %vm413_vm1, %vm411_vm5 }
  0xc3   : > { %v322_v4 = vpop.permute.xlu1 %321  ;;  %v319_v12 = vpop.permute.xlu0 %318  ;;  %vm871_vm10 = vmpackc.low %vm410_vm3, %vm408_vm2  ;;  %870 = vmatpush1.bf16.msk.msra.mxu0 %vm869_vm7, %v1087_v13 }
  0xc4   : > { %vm406_vm11 = vcmp.eq.s32.totalorder %v322_v4, %v1275_v9  ;;  %vm404_vm12 = vcmp.eq.s32.totalorder %v319_v12, %v1275_v9  ;;  %872 = vmatprep.subr.msk.bf16.mxu0 %vm871_vm10, %v1087_v13  ;;  %vm873_vm13 = vmpackc.low %vm409_vm9, %vm407_vm8  ;;  %vm405_vm14 = vcmp.eq.s32.totalorder %v322_v4, %v1272_v6  ;;  %vm403_vm15 = vcmp.eq.s32.totalorder %v319_v12, %v1272_v6 }
  0xc5   : > { %vm875_vm0 = vmpackc.low %vm406_vm11, %vm404_vm12 }
  0xc6   : > { %vm877_vm3 = vmpackc.low %vm405_vm14, %vm403_vm15 }
  0xc7   : > { %v316_v14 = vpop.permute.xlu1 %315  ;;  %v313_v15 = vpop.permute.xlu0 %312  ;;  %874 = vmatpush1.bf16.msk.msra.mxu0 %vm873_vm13, %v1087_v13 }
  0xc8   : > { %vm402_vm1 = vcmp.eq.s32.totalorder %v316_v14, %v1275_v9  ;;  %vm400_vm2 = vcmp.eq.s32.totalorder %v313_v15, %v1275_v9  ;;  %876 = vmatprep.subr.msk.bf16.mxu0 %vm875_vm0, %v1087_v13  ;;  %vm401_vm4 = vcmp.eq.s32.totalorder %v316_v14, %v1272_v6  ;;  %vm399_vm5 = vcmp.eq.s32.totalorder %v313_v15, %v1272_v6 }
  0xc9   : > { %vm879_vm6 = vmpackc.low %vm402_vm1, %vm400_vm2 }
  0xca   : > { %vm881_vm9 = vmpackc.low %vm401_vm4, %vm399_vm5 }
  0xcb   : > { %v310_v16 = vpop.permute.xlu1 %309  ;;  %v307_v17 = vpop.permute.xlu0 %306  ;;  %878 = vmatpush1.bf16.msk.msra.mxu0 %vm877_vm3, %v1087_v13 }
  0xcc   : > { %vm398_vm7 = vcmp.eq.s32.totalorder %v310_v16, %v1275_v9  ;;  %vm396_vm8 = vcmp.eq.s32.totalorder %v307_v17, %v1275_v9  ;;  %880 = vmatprep.subr.msk.bf16.mxu0 %vm879_vm6, %v1087_v13  ;;  %vm397_vm10 = vcmp.eq.s32.totalorder %v310_v16, %v1272_v6  ;;  %vm395_vm11 = vcmp.eq.s32.totalorder %v307_v17, %v1272_v6 }
  0xcd   : > { %vm883_vm12 = vmpackc.low %vm398_vm7, %vm396_vm8 }
  0xce   : > { %vm885_vm15 = vmpackc.low %vm397_vm10, %vm395_vm11 }
  0xcf   : > { %v304_v18 = vpop.permute.xlu1 %303  ;;  %v301_v19 = vpop.permute.xlu0 %300  ;;  %882 = vmatpush1.bf16.msk.msra.mxu0 %vm881_vm9, %v1087_v13 }
  0xd0   : > { %vm394_vm13 = vcmp.eq.s32.totalorder %v304_v18, %v1275_v9  ;;  %vm392_vm14 = vcmp.eq.s32.totalorder %v301_v19, %v1275_v9  ;;  %884 = vmatprep.subr.msk.bf16.mxu0 %vm883_vm12, %v1087_v13  ;;  %vm393_vm0 = vcmp.eq.s32.totalorder %v304_v18, %v1272_v6  ;;  %vm391_vm1 = vcmp.eq.s32.totalorder %v301_v19, %v1272_v6 }
  0xd1   : > { %vm887_vm2 = vmpackc.low %vm394_vm13, %vm392_vm14 }
  0xd2   : > { %vm889_vm5 = vmpackc.low %vm393_vm0, %vm391_vm1 }
  0xd3   : > { %v298_v20 = vpop.permute.xlu1 %297  ;;  %v295_v21 = vpop.permute.xlu0 %294  ;;  %886 = vmatpush1.bf16.msk.msra.mxu0 %vm885_vm15, %v1087_v13 }
  0xd4   : > { %vm390_vm3 = vcmp.eq.s32.totalorder %v298_v20, %v1275_v9  ;;  %vm388_vm4 = vcmp.eq.s32.totalorder %v295_v21, %v1275_v9  ;;  %888 = vmatprep.subr.msk.bf16.mxu0 %vm887_vm2, %v1087_v13  ;;  %vm389_vm6 = vcmp.eq.s32.totalorder %v298_v20, %v1272_v6  ;;  %vm387_vm7 = vcmp.eq.s32.totalorder %v295_v21, %v1272_v6 }
  0xd5   : > { %vm891_vm8 = vmpackc.low %vm390_vm3, %vm388_vm4 }
  0xd6   : > { %vm893_vm11 = vmpackc.low %vm389_vm6, %vm387_vm7 }
  0xd7   : > { %v292_v22 = vpop.permute.xlu1 %291  ;;  %v289_v23 = vpop.permute.xlu0 %288  ;;  %890 = vmatpush1.bf16.msk.msra.mxu0 %vm889_vm5, %v1087_v13 }
  0xd8   : > { %vm386_vm9 = vcmp.eq.s32.totalorder %v292_v22, %v1275_v9  ;;  %vm384_vm10 = vcmp.eq.s32.totalorder %v289_v23, %v1275_v9  ;;  %892 = vmatprep.subr.msk.bf16.mxu0 %vm891_vm8, %v1087_v13  ;;  %vm385_vm12 = vcmp.eq.s32.totalorder %v292_v22, %v1272_v6  ;;  %vm383_vm13 = vcmp.eq.s32.totalorder %v289_v23, %v1272_v6 }
  0xd9   : > { %vm895_vm14 = vmpackc.low %vm386_vm9, %vm384_vm10 }
  0xda   : > { %vm897_vm1 = vmpackc.low %vm385_vm12, %vm383_vm13 }
  0xdb   : > { %v382_v24 = vpop.permute.xlu1 %381  ;;  %v379_v25 = vpop.permute.xlu0 %378  ;;  %894 = vmatpush1.bf16.msk.msra.mxu0 %vm893_vm11, %v1087_v13 }
  0xdc   : > { %vm446_vm15 = vcmp.eq.s32.totalorder %v382_v24, %v1275_v9  ;;  %vm444_vm0 = vcmp.eq.s32.totalorder %v379_v25, %v1275_v9  ;;  %896 = vmatprep.subr.msk.bf16.mxu0 %vm895_vm14, %v1087_v13  ;;  %vm445_vm2 = vcmp.eq.s32.totalorder %v382_v24, %v1272_v6  ;;  %vm443_vm3 = vcmp.eq.s32.totalorder %v379_v25, %v1272_v6 }
  0xdd   : > { %vm899_vm4 = vmpackc.low %vm446_vm15, %vm444_vm0 }
  0xde   : > { %vm901_vm7 = vmpackc.low %vm445_vm2, %vm443_vm3 }
  0xdf   : > { %v376_v26 = vpop.permute.xlu1 %375  ;;  %v373_v27 = vpop.permute.xlu0 %372  ;;  %898 = vmatpush1.bf16.msk.msra.mxu0 %vm897_vm1, %v1087_v13 }
  0xe0   : > { %vm442_vm5 = vcmp.eq.s32.totalorder %v376_v26, %v1275_v9  ;;  %vm440_vm6 = vcmp.eq.s32.totalorder %v373_v27, %v1275_v9  ;;  %900 = vmatprep.subr.msk.bf16.mxu0 %vm899_vm4, %v1087_v13  ;;  %vm441_vm8 = vcmp.eq.s32.totalorder %v376_v26, %v1272_v6  ;;  %vm439_vm9 = vcmp.eq.s32.totalorder %v373_v27, %v1272_v6 }
  0xe1   : > { %vm903_vm10 = vmpackc.low %vm442_vm5, %vm440_vm6 }
  0xe2   : > { %vm905_vm13 = vmpackc.low %vm441_vm8, %vm439_vm9 }
  0xe3   : > { %v370_v28 = vpop.permute.xlu1 %369  ;;  %v367_v29 = vpop.permute.xlu0 %366  ;;  %902 = vmatpush2.bf16.msk.msra.mxu0 %vm901_vm7, %v1087_v13 }
  0xe4   : > { %vm438_vm11 = vcmp.eq.s32.totalorder %v370_v28, %v1275_v9  ;;  %vm436_vm12 = vcmp.eq.s32.totalorder %v367_v29, %v1275_v9  ;;  %904 = vmatprep.subr.msk.bf16.mxu0 %vm903_vm10, %v1087_v13  ;;  %vm437_vm14 = vcmp.eq.s32.totalorder %v370_v28, %v1272_v6  ;;  %vm435_vm15 = vcmp.eq.s32.totalorder %v367_v29, %v1272_v6 }
  0xe5   : > { %vm907_vm0 = vmpackc.low %vm438_vm11, %vm436_vm12 }
  0xe6   : > { %vm909_vm3 = vmpackc.low %vm437_vm14, %vm435_vm15 }
  0xe7   : > { %v364_v30 = vpop.permute.xlu1 %363  ;;  %v361_v31 = vpop.permute.xlu0 %360  ;;  %906 = vmatpush2.bf16.msk.msra.mxu0 %vm905_vm13, %v1087_v13 }
  0xe8   : > { %vm434_vm1 = vcmp.eq.s32.totalorder %v364_v30, %v1275_v9  ;;  %vm432_vm2 = vcmp.eq.s32.totalorder %v361_v31, %v1275_v9  ;;  %908 = vmatprep.subr.msk.bf16.mxu0 %vm907_vm0, %v1087_v13  ;;  %vm433_vm4 = vcmp.eq.s32.totalorder %v364_v30, %v1272_v6  ;;  %vm431_vm5 = vcmp.eq.s32.totalorder %v361_v31, %v1272_v6 }
  0xe9   : > { %vm911_vm6 = vmpackc.low %vm434_vm1, %vm432_vm2 }
  0xea   : > { %vm913_vm9 = vmpackc.low %vm433_vm4, %vm431_vm5 }
  0xeb   : > { %v358_v32 = vpop.permute.xlu1 %357  ;;  %v355_v33 = vpop.permute.xlu0 %354  ;;  %910 = vmatpush2.bf16.msk.msra.mxu0 %vm909_vm3, %v1087_v13 }
  0xec   : > { %vm430_vm7 = vcmp.eq.s32.totalorder %v358_v32, %v1275_v9  ;;  %vm428_vm8 = vcmp.eq.s32.totalorder %v355_v33, %v1275_v9  ;;  %912 = vmatprep.subr.msk.bf16.mxu0 %vm911_vm6, %v1087_v13  ;;  %vm429_vm10 = vcmp.eq.s32.totalorder %v358_v32, %v1272_v6  ;;  %vm427_vm11 = vcmp.eq.s32.totalorder %v355_v33, %v1272_v6 }
  0xed   : > { %vm915_vm12 = vmpackc.low %vm430_vm7, %vm428_vm8 }
  0xee   : > { %vm917_vm15 = vmpackc.low %vm429_vm10, %vm427_vm11 }
  0xef   : > { %v352_v34 = vpop.permute.xlu1 %351  ;;  %v349_v35 = vpop.permute.xlu0 %348  ;;  %914 = vmatpush2.bf16.msk.msra.mxu0 %vm913_vm9, %v1087_v13 }
  0xf0   : > { %vm426_vm13 = vcmp.eq.s32.totalorder %v352_v34, %v1275_v9  ;;  %vm424_vm14 = vcmp.eq.s32.totalorder %v349_v35, %v1275_v9  ;;  %916 = vmatprep.subr.msk.bf16.mxu0 %vm915_vm12, %v1087_v13  ;;  %vm425_vm0 = vcmp.eq.s32.totalorder %v352_v34, %v1272_v6  ;;  %vm423_vm1 = vcmp.eq.s32.totalorder %v349_v35, %v1272_v6 }
  0xf1   : > { %vm919_vm2 = vmpackc.low %vm426_vm13, %vm424_vm14 }
  0xf2   : > { %vm921_vm5 = vmpackc.low %vm425_vm0, %vm423_vm1 }
  0xf3   : > { %v346_v36 = vpop.permute.xlu1 %345  ;;  %v343_v37 = vpop.permute.xlu0 %342  ;;  %918 = vmatpush2.bf16.msk.msra.mxu0 %vm917_vm15, %v1087_v13 }
  0xf4   : > { %vm422_vm3 = vcmp.eq.s32.totalorder %v346_v36, %v1275_v9  ;;  %vm420_vm4 = vcmp.eq.s32.totalorder %v343_v37, %v1275_v9  ;;  %920 = vmatprep.subr.msk.bf16.mxu0 %vm919_vm2, %v1087_v13  ;;  %vm421_vm6 = vcmp.eq.s32.totalorder %v346_v36, %v1272_v6  ;;  %vm419_vm7 = vcmp.eq.s32.totalorder %v343_v37, %v1272_v6 }
  0xf5   : > { %vm923_vm8 = vmpackc.low %vm422_vm3, %vm420_vm4 }
  0xf6   : > { %vm925_vm11 = vmpackc.low %vm421_vm6, %vm419_vm7 }
  0xf7   : > { %v340_v38 = vpop.permute.xlu1 %339  ;;  %v337_v39 = vpop.permute.xlu0 %336  ;;  %922 = vmatpush2.bf16.msk.msra.mxu0 %vm921_vm5, %v1087_v13 }
  0xf8   : > { %vm418_vm9 = vcmp.eq.s32.totalorder %v340_v38, %v1275_v9  ;;  %vm416_vm10 = vcmp.eq.s32.totalorder %v337_v39, %v1275_v9  ;;  %924 = vmatprep.subr.msk.bf16.mxu0 %vm923_vm8, %v1087_v13  ;;  %vm417_vm12 = vcmp.eq.s32.totalorder %v340_v38, %v1272_v6  ;;  %vm415_vm13 = vcmp.eq.s32.totalorder %v337_v39, %v1272_v6 }
  0xf9   : > { %vm927_vm14 = vmpackc.low %vm418_vm9, %vm416_vm10 }
  0xfa   : > { %vm929_vm15 = vmpackc.low %vm417_vm12, %vm415_vm13 }
  0xfb   : > { %926 = vmatpush2.bf16.msk.msra.mxu0 %vm925_vm11, %v1087_v13 }
  0xfc   : > { %928 = vmatprep.subr.msk.bf16.mxu0 %vm927_vm14, %v1087_v13 }
  0xff   : > { %930 = vmatpush2.bf16.msk.msra.mxu0 %vm929_vm15, %v1087_v13 }
 0x102   : > { %656 = vmatmul.mubr.bf16.vlgmr.msra.gmra.mxu0 %v988_v40 }
 0x1c2   : > { %v657_v42 = vpop.f32.mrf.mxu0 }
 0x1c3   : > { %v666_v44 = vadd.f32 %v657_v42, %v607_v41 }
 0x1c4   : > { %v659_v45 = vpop.f32.mrf.mxu0 }
 0x1c5   : > { %670 = vst [vmem:[%s1198_s14] sm:$0xff] %v666_v44  ;;  %v667_v47 = vadd.f32 %v659_v45, %v608_v43 }
 0x1c6   : > { %v661_v48 = vpop.f32.mrf.mxu0 }
 0x1c7   : > { %671 = vst [vmem:[%s1198_s14 + $0x8] sm:$0xff] %v667_v47  ;;  %v668_v50 = vadd.f32 %v661_v48, %v609_v46  ;;  %676 = sbr.rel (!%p1194_p3) target bundleno = 484 (0x1e4), region = 36 }
 0x1c8   : > { %v663_v51 = vpop.f32.mrf.mxu0 }
 0x1c9   : > { %672 = vst [vmem:[%s1198_s14 + $0x10] sm:$0xff] %v668_v50  ;;  %v669_v52 = vadd.f32 %v663_v51, %v610_v49 }
 0x1cb   : > { %673 = vst [vmem:[%s1198_s14 + $0x18] sm:$0xff] %v669_v52 }
 0x1cc   : > { %v677_v53 = vld [vmem:[%s1198_s14] sm:$0xff] }
 0x1cd   : > { %v681_v55 = vmax.f32 %v677_v53, 1.0 }
 0x1ce   : > { %v678_v54 = vld [vmem:[%s1198_s14 + $0x8] sm:$0xff] }
 0x1cf   : > { %v682_v56 = vmax.f32 %v678_v54, 1.0  ;;  %991 = vrcp.f32 %v681_v55 }
 0x1d0   : > { %v679_v60 = vld [vmem:[%s1198_s14 + $0x10] sm:$0xff] }
 0x1d1   : > { %993 = vrcp.f32 %v682_v56 }
 0x1d2   : > { %v680_v63 = vld [vmem:[%s1198_s14 + $0x18] sm:$0xff] }
 0x1dc   : > { %v992_v59 = vpop.eup %991 }
 0x1dd   : > { %v688_v62 = vrot.slane %v992_v59, %v687_v58 }
 0x1de   : > { %v994_v61 = vpop.eup %993 }
 0x1df   : > { %v692_v0 = vrot.slane %v994_v61, %v687_v58  ;;  %v693_v1 = vmul.f32 %v688_v62, %v677_v53  ;;  %v695_v2 = vmul.f32 %v688_v62, %v679_v60 }
 0x1e1   : > { %v694_v3 = vmul.f32 %v692_v0, %v678_v54  ;;  %v696_v6 = vmul.f32 %v692_v0, %v680_v63  ;;  %697 = vst [vmem:[%s1198_s14] sm:$0xff] %v693_v1  ;;  %699 = vst [vmem:[%s1198_s14 + $0x10] sm:$0xff] %v695_v2 }
 0x1e3   : > { %698 = vst [vmem:[%s1198_s14 + $0x8] sm:$0xff] %v694_v3  ;;  %700 = vst [vmem:[%s1198_s14 + $0x18] sm:$0xff] %v696_v6 }
 0x1e4 PF: > { %s937_s15 = scalar_select %p1159_p0, [#allocation3], [#allocation7] }
 0x1e5   : > { %s1469_s27 = smov (!%p1159_p0, %s1144_s27), 0  ;;  %s716_s17 = sshll.u32 %s1198_s14, 4  ;;  %s1399_s17 = int_to_ptr.vmem [resolvable:$true] %s716_s17 }
 0x1e6   : > { %s709_s16 = sld [smem:[%s937_s15 + %s1469_s27]]  ;;  %s1408_s22 = scalar_lea.sflag [#allocation6], %s175_s11 }
 0x1e7   : > { %s1019_s23 = scalar_lea.vmem %s1399_s17, 512  ;;  %s1088_s27 = smov [#allocation5]  }
 0x1e8   : > { %p1020_p11 = scmp.ne.s32.totalorder %s1399_s17, %s1019_s23  ;;  %s1023_s0 = sshll.u32 %s1088_s27, 4  ;;  %s1024_s0 = int_to_ptr.vmem [resolvable:$false] %s1023_s0 }
 0x1e9   : > { %s1025_s28 = scalar_lea.vmem %s1024_s0, 1024  ;;  %p1026_p6 = scmp.lt.s32.totalorder %s1399_s17, %s1024_s0 }
 0x1ea   : > { %p1021_p4 = pnand %p1020_p11, %p1159_p0  ;;  %p1027_p7 = scmp.lt.s32.totalorder %s1025_s28, %s1019_s23 }
 0x1ec   : > { %s936_s18 = sshll.u32 %s709_s16, 8  ;;  %p1022_p5 = pneg %p1021_p4 }
 0x1ed   : > { %s1404_s21 = scalar_lea.hbm %s1451_s4, %s936_s18  ;;  %p1028_p8 = por %p1027_p7, %p1026_p6 }
 0x1ef   : > { %p1029_p9 = pnand %p1028_p8, %p1022_p5 }
 0x1f1   : > { %1032 = shalt.err (!%p1029_p9)
}
 0x1f2   : > { %s1033_s11 = scalar_lea.hbm %s1404_s21, 512  ;;  %s1037_s8 = scalar_lea.hbm %s1451_s4, 1024 }
 0x1f3   : > { %p1034_p10 = scmp.ne.s32.totalorder %s1404_s21, %s1033_s11  ;;  %p1038_p1 = scmp.lt.s32.totalorder %s1404_s21, %s1451_s4 }
 0x1f4   : > { %p1039_p3 = scmp.lt.s32.totalorder %s1037_s8, %s1033_s11 }
 0x1f5   : > { %p1035_p12 = pnand %p1034_p10, %p1159_p0 }
 0x1f6   : > { %p1040_p11 = por %p1039_p3, %p1038_p1 }
 0x1f7   : > { %p1036_p13 = pneg %p1035_p12 }
 0x1f9   : > { %p1041_p4 = pnand %p1040_p11, %p1036_p13 }
 0x1fb   : > { %1044 = shalt.err (!%p1041_p4)
}
 0x1fc   : > { %s1089_s14 = smov 256   ;;  %s1090_s13 = smov 512  }
 0x1fd   : > { %s1091_s15 = smov 16  }
 0x1fe   : > { %939 = dma.vmem_to_hbm [thread:$0]  (%p1159_p0), %s1399_s17, 512, %s1404_s21, %s1408_s22, %s1089_s14, %s1090_s13, %s1091_s15  }
 0x1ff PF: > { %p945_p5 = scmp.ge.s32.totalorder %s1081_s26, 2  ;;  %s731_s16 = sand.u32 1, %s1069_s1  }
 0x200   : > { %s732_s18 = scalar_lea.sflag [#allocation6], %s731_s16 }
 0x201   : > { %p942_p6 = pnand %p945_p5, %p1164_p2 }
 0x203   : > { %p943_p7 = pneg %p942_p6 }
 0x205   : > { %1064 = dma.done.wait (%p943_p7), %s732_s18, 512  }
 0x206   : > { %1066 = vsyncadd (%p943_p7), %s732_s18, 4294966784  ;;  %p24_p8 = scmp.ge.s32.totalorder %s1148_s29, 4   ;;  %s1456_s1 = smov %s1073_s24 }
 0x207   : > { %s1457_s24 = smov %s1077_s25  ;;  %s1458_s25 = smov %s1171_s10 }
 0x208   : > { %s1459_s26 = smov %s1148_s29  ;;  %26 = sbr.rel (!%p24_p8) target bundleno = 28 (0x1c), region = 74 }
 0x20d   :  { %737 = vsyncpa [#allocation6], 1 }
 0x20e   :  { %739 = vsyncpa [#allocation6 + $0x1], 1 }

</bundles_post_ra>
